<compile_context>
chip_gen: v6e
topology: v6e:2x2x1
jax: 0.10.0
libtpu: 0.0.40
codegen_flags: <defaults>
</compile_context>

<pallas_src>
import jax
import jax.numpy as jnp
from jax.experimental import pallas as pl
from jax.experimental.pallas import tpu as pltpu

_HIGHEST = jax.lax.Precision.HIGHEST


def _round_up(x, m):
    return (x + m - 1) // m * m


# ----------------------------------------------------------------------------- kernel
def _make_kernel(i_pad, hidden_size, out_w):
    """Fused 2-layer RNN step + FC head, iterated over grid=(T,).

    Weight-slab row layout (lane width = H, every block start is a multiple of 8):
      rows [0, i_pad)          : W_ih0^T  (rows >= I zeroed)
      rows [i_pad, i_pad+H)    : W_hh0^T
      next H rows              : W_ih1^T
      next H rows              : W_hh1^T
      next H rows              : W_fc^T   (lanes >= O zeroed)
      next 8 rows              : row 0 = b0 = b_ih0 + b_hh0
      next 8 rows              : row 0 = b1 = b_ih1 + b_hh1
      next 8 rows              : row 0 = b_fc (lanes >= O zeroed)
    """
    H = hidden_size
    r_wih0 = 0
    r_whh0 = r_wih0 + i_pad
    r_wih1 = r_whh0 + H
    r_whh1 = r_wih1 + H
    r_wfc = r_whh1 + H
    r_b0 = r_wfc + H
    r_b1 = r_b0 + 8
    r_bfc = r_b1 + 8
    rows = r_bfc + 8

    def dot(a, b):
        return jnp.dot(a, b, preferred_element_type=jnp.float32, precision=_HIGHEST)

    def kernel(x_ref, h0i_ref, h1i_ref, w_ref, out_ref, h0_sc, h1_sc):
        t = pl.program_id(0)
        last = pl.num_programs(0) - 1

        @pl.when(t == 0)
        def _init():
            h0_sc[...] = h0i_ref[...]
            h1_sc[...] = h1i_ref[...]
            out_ref[...] = jnp.zeros_like(out_ref)

        xt = x_ref[0]                       # (Bp, i_pad)
        h0 = h0_sc[...]                     # (Bp, H)
        h1 = h1_sc[...]                     # (Bp, H)

        w_ih0 = w_ref[r_wih0:r_whh0, :]
        w_hh0 = w_ref[r_whh0:r_wih1, :]
        w_ih1 = w_ref[r_wih1:r_whh1, :]
        w_hh1 = w_ref[r_whh1:r_wfc, :]
        b0 = w_ref[r_b0:r_b0 + 1, :]        # (1, H) broadcast in the add
        b1 = w_ref[r_b1:r_b1 + 1, :]

        # Layer 0 / layer 1: split dots (independent dots overlap on the MXU).
        h0n = jnp.tanh(dot(xt, w_ih0) + dot(h0, w_hh0) + b0)
        h1n = jnp.tanh(dot(h0n, w_ih1) + dot(h1, w_hh1) + b1)

        h0_sc[...] = h0n
        h1_sc[...] = h1n

        @pl.when(t == last)
        def _emit():
            w_fc = w_ref[r_wfc:r_b0, :]          # (H, H), lanes >= O zero
            bfc = w_ref[r_bfc:r_bfc + 1, :]      # (1, H), lanes >= O zero
            logits = dot(h1n, w_fc) + bfc        # logits live in lanes [0, O)
            # Lane-packed output: [h0_new | h1_new | logits | zero pad].
            out_ref[:, 0:H] = h0n
            out_ref[:, H:2 * H] = h1n
            out_ref[:, 2 * H:3 * H] = logits

    return kernel, rows


# ----------------------------------------------------------------------------- params
def init_params(key, input_size=4, hidden_size=32, output_size=2):
    """PyTorch-default-style init: U(-1/sqrt(H), 1/sqrt(H)).
    Weights stored transposed: (in_features, out_features)."""
    ks = jax.random.split(key, 10)
    bound = 1.0 / jnp.sqrt(hidden_size)

    def u(k, shape):
        return jax.random.uniform(k, shape, jnp.float32, -bound, bound)

    return {
        "w_ih0": u(ks[0], (input_size, hidden_size)),
        "w_hh0": u(ks[1], (hidden_size, hidden_size)),
        "b_ih0": u(ks[2], (1, hidden_size)),
        "b_hh0": u(ks[3], (1, hidden_size)),
        "w_ih1": u(ks[4], (hidden_size, hidden_size)),
        "w_hh1": u(ks[5], (hidden_size, hidden_size)),
        "b_ih1": u(ks[6], (1, hidden_size)),
        "b_hh1": u(ks[7], (1, hidden_size)),
        "w_fc": u(ks[8], (hidden_size, output_size)),
        "b_fc": u(ks[9], (1, output_size)),
    }


def pack_params(raw, input_size, hidden_size, output_size):
    """One-time host-side packing into a single contiguous f32 weight slab."""
    I, H, O = input_size, hidden_size, output_size
    assert H % 8 == 0, "hidden_size must be a multiple of 8 for 8-aligned slab rows"
    i_pad = _round_up(I, 8)

    w_ih0 = jnp.concatenate(
        [raw["w_ih0"], jnp.zeros((i_pad - I, H), jnp.float32)], axis=0)   # (i_pad, H)
    w_fc = jnp.zeros((H, H), jnp.float32).at[:, :O].set(raw["w_fc"])      # (H, H)
    b0 = jnp.zeros((8, H), jnp.float32).at[0:1, :].set(raw["b_ih0"] + raw["b_hh0"])
    b1 = jnp.zeros((8, H), jnp.float32).at[0:1, :].set(raw["b_ih1"] + raw["b_hh1"])
    bfc = jnp.zeros((8, H), jnp.float32).at[0:1, :O].set(raw["b_fc"])

    slab = jnp.concatenate(
        [w_ih0, raw["w_hh0"], raw["w_ih1"], raw["w_hh1"], w_fc, b0, b1, bfc],
        axis=0)                                                            # (rows, H)
    meta = dict(input_size=I, hidden_size=H, output_size=O, input_size_pad=i_pad)
    return slab, meta


# ----------------------------------------------------------------------------- wrapper
def stacked_policy_rnn_forward(x, h, slab, meta):
    """x: (B, T, I) f32, h: (L=2, B, H) f32 -> (logits (B, O), h_new (L, B, H)).

    For T == 1 this matches the PyTorch module's forward exactly; for T > 1 the
    time loop runs inside the kernel (grid=(T,)) and logits come from the last step.
    """
    B, T, I = x.shape
    L, Bh, H = h.shape
    assert L == 2 and Bh == B
    assert I == meta["input_size"] and H == meta["hidden_size"]
    O = meta["output_size"]
    i_pad = meta["input_size_pad"]

    Bp = max(8, _round_up(B, 8))          # batch padded to a sublane multiple
    out_w = _round_up(3 * H, 128)         # lane-dense packed output width

    # (B, T, I) -> (T, Bp, i_pad): time maps to the grid; per-step block's trailing
    # dims equal the full array dims. Pad rows/lanes are zero and sliced off below.
    xt = jnp.transpose(x, (1, 0, 2))
    xt = jnp.pad(xt, ((0, 0), (0, Bp - B), (0, i_pad - I)))
    h0_init = jnp.pad(h[0], ((0, Bp - B), (0, 0)))
    h1_init = jnp.pad(h[1], ((0, Bp - B), (0, 0)))

    kernel, rows = _make_kernel(i_pad, H, out_w)
    assert slab.shape == (rows, H)

    packed = pl.pallas_call(
        kernel,
        out_shape=jax.ShapeDtypeStruct((Bp, out_w), jnp.float32),
        grid_spec=pltpu.PrefetchScalarGridSpec(
            num_scalar_prefetch=0,
            grid=(T,),
            in_specs=[
                pl.BlockSpec((1, Bp, i_pad), lambda t: (t, 0, 0)),   # x, blocked over T
                pl.BlockSpec((Bp, H), lambda t: (0, 0)),             # h0 init (resident)
                pl.BlockSpec((Bp, H), lambda t: (0, 0)),             # h1 init (resident)
                pl.BlockSpec((rows, H), lambda t: (0, 0)),           # weight slab (resident)
            ],
            out_specs=pl.BlockSpec((Bp, out_w), lambda t: (0, 0)),   # resident, written last
            scratch_shapes=[pltpu.VMEM((Bp, H), jnp.float32),        # h0 carry
                            pltpu.VMEM((Bp, H), jnp.float32)],       # h1 carry
        ),
        compiler_params=pltpu.CompilerParams(
            dimension_semantics=("arbitrary",)),
    )(xt, h0_init, h1_init, slab)

    logits = packed[:B, 2 * H:2 * H + O]
    h_new = jnp.stack([packed[:B, 0:H], packed[:B, H:2 * H]], axis=0)
    return logits, h_new


# ----------------------------------------------------------------------------- reference
def _reference_forward(x, h, p):
    """Pure-JAX reference of the PyTorch forward (sequence rollout, logits at last step)."""
    B, T, _ = x.shape
    h0, h1 = h[0], h[1]
    dot = lambda a, b: jnp.dot(a, b, precision=_HIGHEST)
    for t in range(T):
        xt = x[:, t, :]
        h0 = jnp.tanh(dot(xt, p["w_ih0"]) + p["b_ih0"] + dot(h0, p["w_hh0"]) + p["b_hh0"])
        h1 = jnp.tanh(dot(h0, p["w_ih1"]) + p["b_ih1"] + dot(h1, p["w_hh1"]) + p["b_hh1"])
    logits = dot(h1, p["w_fc"]) + p["b_fc"]
    return logits, jnp.stack([h0, h1], axis=0)


if __name__ == "__main__":
    key = jax.random.PRNGKey(0)
    k_p, k_x1, k_h1, k_x2, k_h2 = jax.random.split(key, 5)

    input_size, hidden_size, num_layers, output_size = 4, 32, 2, 2

    raw = init_params(k_p, input_size, hidden_size, output_size)
    slab, meta = pack_params(raw, input_size, hidden_size, output_size)

    # --- Test 1: module-spec shapes (batch=1, seq_len=1) -------------------------
    x1 = jax.random.normal(k_x1, (1, 1, input_size), jnp.float32)
    hin1 = jax.random.normal(k_h1, (num_layers, 1, hidden_size), jnp.float32)
    logits1, hnew1 = stacked_policy_rnn_forward(x1, hin1, slab, meta)
    jax.block_until_ready((logits1, hnew1))
    ref_l1, ref_h1 = _reference_forward(x1, hin1, raw)
    assert logits1.shape == (1, output_size)
    assert hnew1.shape == (num_layers, 1, hidden_size)
    assert jnp.allclose(logits1, ref_l1, atol=1e-5, rtol=1e-5)
    assert jnp.allclose(hnew1, ref_h1, atol=1e-5, rtol=1e-5)

    # --- Test 2: rollout with the time loop inside the kernel (batch=2, seq=8) ---
    x2 = jax.random.normal(k_x2, (2, 8, input_size), jnp.float32)
    hin2 = jax.random.normal(k_h2, (num_layers, 2, hidden_size), jnp.float32)
    logits2, hnew2 = stacked_policy_rnn_forward(x2, hin2, slab, meta)
    jax.block_until_ready((logits2, hnew2))
    ref_l2, ref_h2 = _reference_forward(x2, hin2, raw)
    assert logits2.shape == (2, output_size)
    assert hnew2.shape == (num_layers, 2, hidden_size)
    assert jnp.allclose(logits2, ref_l2, atol=1e-4, rtol=1e-4)
    assert jnp.allclose(hnew2, ref_h2, atol=1e-4, rtol=1e-4)

    print("KERNEL_OK")
</pallas_src>

<mosaic_0001>
module attributes {stable_mosaic.version = 11 : i64} {
  func.func @kernel(%arg0: i32, %arg1: memref<1x8x8xf32, #tpu.memory_space<vmem>>, %arg2: memref<8x32xf32, #tpu.memory_space<vmem>>, %arg3: memref<8x32xf32, #tpu.memory_space<vmem>>, %arg4: memref<160x32xf32, #tpu.memory_space<vmem>>, %arg5: memref<8x128xf32, #tpu.memory_space<vmem>>, %arg6: memref<8x32xf32, #tpu.memory_space<vmem>>, %arg7: memref<8x32xf32, #tpu.memory_space<vmem>>) attributes {dimension_semantics = [#tpu.dimension_semantics<arbitrary>], iteration_bounds = array<i64: 1>, scalar_prefetch = 0 : i64, scratch_operands = 2 : i64, tpu.core_type = #tpu.core_type<tc>, window_params = [{transform_indices = @transform_0, window_bounds = array<i64: 1, 8, 8>}, {pipeline_mode = #tpu.pipeline_mode<synchronous>, transform_indices = @transform_1, window_bounds = array<i64: 8, 32>}, {pipeline_mode = #tpu.pipeline_mode<synchronous>, transform_indices = @transform_2, window_bounds = array<i64: 8, 32>}, {pipeline_mode = #tpu.pipeline_mode<synchronous>, transform_indices = @transform_3, window_bounds = array<i64: 160, 32>}, {pipeline_mode = #tpu.pipeline_mode<synchronous>, transform_indices = @transform_4, window_bounds = array<i64: 8, 128>}]} {
    %c0_i32 = arith.constant 0 : i32
    %0 = arith.cmpi eq, %arg0, %c0_i32 : i32
    %1 = arith.extui %0 : i1 to i32
    %c0_i32_0 = arith.constant 0 : i32
    %2 = arith.cmpi ne, %1, %c0_i32_0 : i32
    scf.if %2 {
      %c0_23 = arith.constant 0 : index
      %c0_24 = arith.constant 0 : index
      %30 = vector.load %arg2[%c0_23, %c0_24] : memref<8x32xf32, #tpu.memory_space<vmem>>, vector<8x32xf32>
      %c0_25 = arith.constant 0 : index
      %c0_26 = arith.constant 0 : index
      %31 = vector.load %arg6[%c0_25, %c0_26] : memref<8x32xf32, #tpu.memory_space<vmem>>, vector<8x32xf32>
      tpu.vector_store %arg6[%c0_25, %c0_26], %30 {strides = array<i32>} : memref<8x32xf32, #tpu.memory_space<vmem>>, vector<8x32xf32>,
      %c0_27 = arith.constant 0 : index
      %c0_28 = arith.constant 0 : index
      %32 = vector.load %arg3[%c0_27, %c0_28] : memref<8x32xf32, #tpu.memory_space<vmem>>, vector<8x32xf32>
      %c0_29 = arith.constant 0 : index
      %c0_30 = arith.constant 0 : index
      %33 = vector.load %arg7[%c0_29, %c0_30] : memref<8x32xf32, #tpu.memory_space<vmem>>, vector<8x32xf32>
      tpu.vector_store %arg7[%c0_29, %c0_30], %32 {strides = array<i32>} : memref<8x32xf32, #tpu.memory_space<vmem>>, vector<8x32xf32>,
      %cst_31 = arith.constant 0.000000e+00 : f32
      %34 = vector.broadcast %cst_31 : f32 to vector<8x128xf32>
      %c0_32 = arith.constant 0 : index
      %c0_33 = arith.constant 0 : index
      %35 = vector.load %arg5[%c0_32, %c0_33] : memref<8x128xf32, #tpu.memory_space<vmem>>, vector<8x128xf32>
      tpu.vector_store %arg5[%c0_32, %c0_33], %34 {strides = array<i32>} : memref<8x128xf32, #tpu.memory_space<vmem>>, vector<8x128xf32>,
    } else {
    }
    %c0 = arith.constant 0 : index
    %c0_1 = arith.constant 0 : index
    %c0_2 = arith.constant 0 : index
    %3 = vector.load %arg1[%c0, %c0_1, %c0_2] : memref<1x8x8xf32, #tpu.memory_space<vmem>>, vector<1x8x8xf32>
    %4 = vector.shape_cast %3 : vector<1x8x8xf32> to vector<8x8xf32>
    %c0_3 = arith.constant 0 : index
    %c0_4 = arith.constant 0 : index
    %5 = vector.load %arg6[%c0_3, %c0_4] : memref<8x32xf32, #tpu.memory_space<vmem>>, vector<8x32xf32>
    %c0_5 = arith.constant 0 : index
    %c0_6 = arith.constant 0 : index
    %6 = vector.load %arg7[%c0_5, %c0_6] : memref<8x32xf32, #tpu.memory_space<vmem>>, vector<8x32xf32>
    %c0_7 = arith.constant 0 : index
    %c0_8 = arith.constant 0 : index
    %7 = vector.load %arg4[%c0_7, %c0_8] : memref<160x32xf32, #tpu.memory_space<vmem>>, vector<8x32xf32>
    %c8 = arith.constant 8 : index
    %c0_9 = arith.constant 0 : index
    %8 = vector.load %arg4[%c8, %c0_9] : memref<160x32xf32, #tpu.memory_space<vmem>>, vector<32x32xf32>
    %c40 = arith.constant 40 : index
    %c0_10 = arith.constant 0 : index
    %9 = vector.load %arg4[%c40, %c0_10] : memref<160x32xf32, #tpu.memory_space<vmem>>, vector<32x32xf32>
    %c72 = arith.constant 72 : index
    %c0_11 = arith.constant 0 : index
    %10 = vector.load %arg4[%c72, %c0_11] : memref<160x32xf32, #tpu.memory_space<vmem>>, vector<32x32xf32>
    %c136 = arith.constant 136 : index
    %c0_12 = arith.constant 0 : index
    %11 = vector.load %arg4[%c136, %c0_12] : memref<160x32xf32, #tpu.memory_space<vmem>>, vector<1x32xf32>
    %c144 = arith.constant 144 : index
    %c0_13 = arith.constant 0 : index
    %12 = vector.load %arg4[%c144, %c0_13] : memref<160x32xf32, #tpu.memory_space<vmem>>, vector<1x32xf32>
    %cst = arith.constant dense<0.000000e+00> : vector<8x32xf32>
    %13 = tpu.matmul %4, %7, %cst {dimension_numbers = #tpu.dot_dimension_numbers<[1], [0], [0], [1], [0, 0, 1, 1], [], []>, precision = #tpu.contract_precision<fp32>} : vector<8x8xf32>, vector<8x32xf32>, vector<8x32xf32> -> vector<8x32xf32>
    %cst_14 = arith.constant dense<0.000000e+00> : vector<8x32xf32>
    %14 = tpu.matmul %5, %8, %cst_14 {dimension_numbers = #tpu.dot_dimension_numbers<[1], [0], [0], [1], [0, 0, 1, 1], [], []>, precision = #tpu.contract_precision<fp32>} : vector<8x32xf32>, vector<32x32xf32>, vector<8x32xf32> -> vector<8x32xf32>
    %15 = arith.addf %13, %14 : vector<8x32xf32>
    %16 = vector.broadcast %11 : vector<1x32xf32> to vector<8x32xf32>
    %17 = arith.addf %15, %16 : vector<8x32xf32>
    %18 = math.tanh %17 : vector<8x32xf32>
    %cst_15 = arith.constant dense<0.000000e+00> : vector<8x32xf32>
    %19 = tpu.matmul %18, %9, %cst_15 {dimension_numbers = #tpu.dot_dimension_numbers<[1], [0], [0], [1], [0, 0, 1, 1], [], []>, precision = #tpu.contract_precision<fp32>} : vector<8x32xf32>, vector<32x32xf32>, vector<8x32xf32> -> vector<8x32xf32>
    %cst_16 = arith.constant dense<0.000000e+00> : vector<8x32xf32>
    %20 = tpu.matmul %6, %10, %cst_16 {dimension_numbers = #tpu.dot_dimension_numbers<[1], [0], [0], [1], [0, 0, 1, 1], [], []>, precision = #tpu.contract_precision<fp32>} : vector<8x32xf32>, vector<32x32xf32>, vector<8x32xf32> -> vector<8x32xf32>
    %21 = arith.addf %19, %20 : vector<8x32xf32>
    %22 = vector.broadcast %12 : vector<1x32xf32> to vector<8x32xf32>
    %23 = arith.addf %21, %22 : vector<8x32xf32>
    %24 = math.tanh %23 : vector<8x32xf32>
    %c0_17 = arith.constant 0 : index
    %c0_18 = arith.constant 0 : index
    %25 = vector.load %arg6[%c0_17, %c0_18] : memref<8x32xf32, #tpu.memory_space<vmem>>, vector<8x32xf32>
    tpu.vector_store %arg6[%c0_17, %c0_18], %18 {strides = array<i32>} : memref<8x32xf32, #tpu.memory_space<vmem>>, vector<8x32xf32>,
    %c0_19 = arith.constant 0 : index
    %c0_20 = arith.constant 0 : index
    %26 = vector.load %arg7[%c0_19, %c0_20] : memref<8x32xf32, #tpu.memory_space<vmem>>, vector<8x32xf32>
    tpu.vector_store %arg7[%c0_19, %c0_20], %24 {strides = array<i32>} : memref<8x32xf32, #tpu.memory_space<vmem>>, vector<8x32xf32>,
    %c0_i32_21 = arith.constant 0 : i32
    %27 = arith.cmpi eq, %arg0, %c0_i32_21 : i32
    %28 = arith.extui %27 : i1 to i32
    %c0_i32_22 = arith.constant 0 : i32
    %29 = arith.cmpi ne, %28, %c0_i32_22 : i32
    scf.if %29 {
      %c104 = arith.constant 104 : index
      %c0_23 = arith.constant 0 : index
      %30 = vector.load %arg4[%c104, %c0_23] : memref<160x32xf32, #tpu.memory_space<vmem>>, vector<32x32xf32>
      %c152 = arith.constant 152 : index
      %c0_24 = arith.constant 0 : index
      %31 = vector.load %arg4[%c152, %c0_24] : memref<160x32xf32, #tpu.memory_space<vmem>>, vector<1x32xf32>
      %cst_25 = arith.constant dense<0.000000e+00> : vector<8x32xf32>
      %32 = tpu.matmul %24, %30, %cst_25 {dimension_numbers = #tpu.dot_dimension_numbers<[1], [0], [0], [1], [0, 0, 1, 1], [], []>, precision = #tpu.contract_precision<fp32>} : vector<8x32xf32>, vector<32x32xf32>, vector<8x32xf32> -> vector<8x32xf32>
      %33 = vector.broadcast %31 : vector<1x32xf32> to vector<8x32xf32>
      %34 = arith.addf %32, %33 : vector<8x32xf32>
      %c0_26 = arith.constant 0 : index
      %c0_27 = arith.constant 0 : index
      %35 = vector.load %arg5[%c0_26, %c0_27] : memref<8x128xf32, #tpu.memory_space<vmem>>, vector<8x32xf32>
      tpu.vector_store %arg5[%c0_26, %c0_27], %18 {strides = array<i32>} : memref<8x128xf32, #tpu.memory_space<vmem>>, vector<8x32xf32>,
      %c0_28 = arith.constant 0 : index
      %c32 = arith.constant 32 : index
      %36 = vector.load %arg5[%c0_28, %c32] : memref<8x128xf32, #tpu.memory_space<vmem>>, vector<8x32xf32>
      tpu.vector_store %arg5[%c0_28, %c32], %24 {strides = array<i32>} : memref<8x128xf32, #tpu.memory_space<vmem>>, vector<8x32xf32>,
      %c0_29 = arith.constant 0 : index
      %c64 = arith.constant 64 : index
      %37 = vector.load %arg5[%c0_29, %c64] : memref<8x128xf32, #tpu.memory_space<vmem>>, vector<8x32xf32>
      tpu.vector_store %arg5[%c0_29, %c64], %34 {strides = array<i32>} : memref<8x128xf32, #tpu.memory_space<vmem>>, vector<8x32xf32>,
    } else {
    }
    return
  }
  func.func @transform_0(%arg0: i32) -> (i32, i32, i32) {
    %c0_i32 = arith.constant 0 : i32
    %c0_i32_0 = arith.constant 0 : i32
    %c0_i32_1 = arith.constant 0 : i32
    return %arg0, %c0_i32, %c0_i32_0 : i32, i32, i32
  }
  func.func @transform_1(%arg0: i32) -> (i32, i32) {
    %c0_i32 = arith.constant 0 : i32
    %c0_i32_0 = arith.constant 0 : i32
    %c0_i32_1 = arith.constant 0 : i32
    return %c0_i32, %c0_i32_0 : i32, i32
  }
  func.func @transform_2(%arg0: i32) -> (i32, i32) {
    %c0_i32 = arith.constant 0 : i32
    %c0_i32_0 = arith.constant 0 : i32
    %c0_i32_1 = arith.constant 0 : i32
    return %c0_i32, %c0_i32_0 : i32, i32
  }
  func.func @transform_3(%arg0: i32) -> (i32, i32) {
    %c0_i32 = arith.constant 0 : i32
    %c0_i32_0 = arith.constant 0 : i32
    %c0_i32_1 = arith.constant 0 : i32
    return %c0_i32, %c0_i32_0 : i32, i32
  }
  func.func @transform_4(%arg0: i32) -> (i32, i32) {
    %c0_i32 = arith.constant 0 : i32
    %c0_i32_0 = arith.constant 0 : i32
    %c0_i32_1 = arith.constant 0 : i32
    return %c0_i32, %c0_i32_0 : i32, i32
  }
}

</mosaic_0001>

<bundles_post_ra>
// kernel: tpu_custom_call.1
= control target key start
LH: loop header
LB: loop body
LE: loop exit
PB: predicated region body
PF: predicated region fallthrough
CT: control target
= control target key end

     0   :  { %vm23_vm0 = vcmask 261120   ;;  %v2961_v3 = vmov 0.0   ;;  %vm2962_vm1 = vmmov 0   ;;  %s3499_s0 = inlined_call_operand.vmem [shape: f32[1,8,8], index: 0, kind: input, shape index: {}]   ;;  %s3500_s1 = inlined_call_operand.vmem [shape: f32[8,32], index: 1, kind: input, shape index: {}]   ;;  %s3501_s2 = inlined_call_operand.vmem [shape: f32[8,32], index: 2, kind: input, shape index: {}]   ;;  %s3502_s3 = inlined_call_operand.vmem [shape: f32[160,32], index: 3, kind: input, shape index: {}]   ;;  %s3503_s4 = inlined_call_operand.hbm [shape: f32[8,128], index: 4, kind: output, shape index: {}]  }
   0x1   :  { %v35_v0 = vld [vmem:[%s3502_s3 + $0x20] sm:$0xff]  ;;  %v34_v1 = vld [vmem:[%s3502_s3 + $0x18] sm:$0xff]  ;;  %v33_v2 = vld [vmem:[%s3502_s3 + $0x10] sm:$0xff]  ;;  %2636 = vmatprep.subr.mxu0 %v2961_v3  ;;  %27 = vst [vmem:[#allocation4] sm:$0xff] %v2961_v3  ;;  %2647 = vmatprep.subr.mxu1 %v2961_v3 }
   0x2   :  { %v3002_v4 = vand.u32 4294901760, %v35_v0  ;;  %v3005_v5 = vand.u32 4294901760, %v34_v1  ;;  %v3007_v6 = vand.u32 4294901760, %v33_v2  ;;  %v32_v7 = vld [vmem:[%s3502_s3 + $0x8] sm:$0xff]  ;;  %v22_v8 = vld [vmem:[%s3500_s1] sm:$0xff]  ;;  %2644 = vmatprep.mubr.msk.f32.mxu0 %vm2962_vm1, %v2961_v3  ;;  %2655 = vmatprep.mubr.msk.f32.mxu1 %vm2962_vm1, %v2961_v3 }
   0x3   :  { %v3015_v9 = vand.u32 4294901760, %v32_v7  ;;  %24 = vst.msk [vmem:[#allocation2] sm:$0xff] %vm23_vm0, %v22_v8 }
   0x4   :  { %9 = vsyncpa [#allocation5], 0  ;;  %2637 = vmatpush3.msra.mxu0 %v3002_v4  ;;  %v3024_v10 = vsub.f32 %v35_v0, %v3002_v4  ;;  %v3027_v11 = vsub.f32 %v34_v1, %v3005_v5  ;;  %v3030_v12 = vsub.f32 %v33_v2, %v3007_v6  ;;  %v28_v31 = vld [vmem:[%s3499_s0] sm:$0xff]  ;;  %vm535_vm2 = vcmask 64512   ;;  %v42_v49 = vld [vmem:[%s3502_s3 + $0x58] sm:$0xff]  ;;  %s2963_s28 = smov 32  }
   0x5   :  { %2638 = vmatprep.subr.mxu0 %v2961_v3  ;;  %v3034_v13 = vsub.f32 %v32_v7, %v3015_v9  ;;  %v31_v33 = vld [vmem:[%s3502_s3] sm:$0xff]  ;;  %v537_v34 = vsel %vm535_vm2, %v28_v31, 0  ;;  %v3169_v51 = vand.u32 4294901760, %v42_v49  ;;  %v41_v52 = vld [vmem:[%s3502_s3 + $0x50] sm:$0xff]  ;;  %v40_v56 = vld [vmem:[%s3502_s3 + $0x48] sm:$0xff]  ;;  %vm2479_vm3 = vcmask 523520  }
   0x6   :  { %v156_v14 = vand.u32 4294901760, %v3024_v10  ;;  %2639 = vmatpush3.msra.mxu0 %v3005_v5  ;;  %v163_v15 = vand.u32 4294901760, %v3027_v11  ;;  %v170_v16 = vand.u32 4294901760, %v3030_v12  ;;  %v3078_v36 = vand.u32 4294901760, %v31_v33  ;;  %v25_v46 = vld [vmem:[%s3501_s2] sm:$0xff]  ;;  %s2964_s5 = smov 64  }
   0x7   :  { %2640 = vmatprep.subr.mxu0 %v2961_v3  ;;  %v177_v17 = vand.u32 4294901760, %v3034_v13  ;;  %v3080_v37 = vand.u32 4294901760, %v537_v34  ;;  %26 = vst.msk [vmem:[#allocation3] sm:$0xff] %vm23_vm0, %v25_v46  ;;  %v43_v47 = vld [vmem:[%s3502_s3 + $0x60] sm:$0xff]  ;;  %v3178_v54 = vsub.f32 %v42_v49, %v3169_v51  ;;  %v3180_v55 = vand.u32 4294901760, %v41_v52  ;;  %s2965_s6 = smov [#allocation4]  }
   0x8   :  { %v157_v18 = vsub.f32 %v3024_v10, %v156_v14  ;;  %v164_v19 = vsub.f32 %v3027_v11, %v163_v15  ;;  %2641 = vmatpush3.msra.mxu0 %v3007_v6  ;;  %v171_v20 = vsub.f32 %v3030_v12, %v170_v16  ;;  %v647_v38 = vsub.f32 %v31_v33, %v3078_v36  ;;  %s2493_s2 = sshll.u32 %s2965_s6, 4  ;;  %s2494_s2 = int_to_ptr.vmem [resolvable:$true] %s2493_s2 }
   0x9   :  { %2642 = vmatprep.subr.mxu0 %v2961_v3  ;;  %v178_v23 = vsub.f32 %v3034_v13, %v177_v17  ;;  %v606_v39 = vsub.f32 %v537_v34, %v3080_v37  ;;  %v3160_v48 = vand.u32 4294901760, %v43_v47  ;;  %v1107_v59 = vand.u32 4294901760, %v3178_v54  ;;  %p2944_p1 = scmp.lt.s32.totalorder %s2494_s2, %s2494_s2 }
   0xa   :  { %v158_v21 = vand.u32 4294901760, %v157_v18  ;;  %v165_v22 = vand.u32 4294901760, %v164_v19  ;;  %2643 = vmatpush3.msra.mxu0 %v3015_v9  ;;  %v29_v24 = vld [vmem:[#allocation2] sm:$0xff]  ;;  %v172_v26 = vand.u32 4294901760, %v171_v20  ;;  %v648_v40 = vand.u32 4294901760, %v647_v38  ;;  %v37_v20 = vld [vmem:[%s3502_s3 + $0x30] sm:$0xff] }
   0xb   :  { %2658 = vmatprep.subr.mxu0 %v2961_v3  ;;  %v48_v25 = vsel %vm23_vm0, %v29_v24, 0  ;;  %v179_v28 = vand.u32 4294901760, %v178_v23  ;;  %v607_v41 = vand.u32 4294901760, %v606_v39  ;;  %v3167_v50 = vsub.f32 %v43_v47, %v3160_v48  ;;  %v36_v24 = vld [vmem:[%s3502_s3 + $0x28] sm:$0xff] }
   0xc   :  { %2648 = vmatpush3.msra.mxu1 %v158_v21  ;;  %v3059_v27 = vand.u32 4294901760, %v48_v25  ;;  %v649_v42 = vsub.f32 %v647_v38, %v648_v40  ;;  %v3192_v60 = vsub.f32 %v41_v52, %v3180_v55  ;;  %v3194_v61 = vand.u32 4294901760, %v40_v56 }
   0xd   :  { %2649 = vmatprep.subr.mxu1 %v2961_v3  ;;  %v608_v43 = vsub.f32 %v606_v39, %v607_v41  ;;  %v1100_v53 = vand.u32 4294901760, %v3167_v50  ;;  %v1108_v0 = vsub.f32 %v3178_v54, %v1107_v59  ;;  %v3264_v23 = vand.u32 4294901760, %v37_v20 }
   0xe   :  { %2650 = vmatpush3.msra.mxu1 %v165_v22  ;;  %v120_v29 = vsub.f32 %v48_v25, %v3059_v27  ;;  %v650_v44 = vand.u32 4294901760, %v649_v42  ;;  %v30_v57 = vld [vmem:[#allocation3] sm:$0xff]  ;;  %v1114_v1 = vand.u32 4294901760, %v3192_v60  ;;  %v3204_v2 = vsub.f32 %v40_v56, %v3194_v61 }
   0xf   :  { %2651 = vmatprep.subr.mxu1 %v2961_v3  ;;  %v609_v45 = vand.u32 4294901760, %v608_v43  ;;  %v1101_v58 = vsub.f32 %v3167_v50, %v1100_v53  ;;  %v992_v62 = vsel %vm23_vm0, %v30_v57, 0  ;;  %vm2485_vm4 = vcmask 785920  }
  0x10   :  { %2652 = vmatpush3.msra.mxu1 %v172_v26  ;;  %v121_v30 = vand.u32 4294901760, %v120_v29  ;;  %v1121_v7 = vand.u32 4294901760, %v3204_v2 }
  0x11   :  { %2653 = vmatprep.subr.mxu1 %v2961_v3  ;;  %v1102_v63 = vand.u32 4294901760, %v1101_v58 }
  0x12   :  { %2654 = vmatpush3.msra.mxu1 %v179_v28  ;;  %v122_v32 = vsub.f32 %v120_v29, %v121_v30  ;;  %v3281_v28 = vand.u32 4294901760, %v36_v24 }
  0x13   :  { %2656 = vmatmul.mubr.f32.vlgmr.msra.gmra.mxu1 %v3059_v27  ;;  %2669 = vmatprep.subr.mxu1 %v2961_v3 }
  0x14   :  { %v123_v35 = vand.u32 4294901760, %v122_v32  ;;  %2670 = vmatpush3.msra.mxu1 %v3002_v4  ;;  %2677 = vmatprep.mubr.msk.f32.mxu1 %vm2962_vm1, %v2961_v3  ;;  %v3293_v31 = vsub.f32 %v36_v24, %v3281_v28 }
  0x15   :  { %2671 = vmatprep.subr.mxu1 %v2961_v3 }
  0x16   :  { %2645 = vmatmul.mubr.f32.vlgmr.msra.gmra.mxu0 %v123_v35  ;;  %2672 = vmatpush3.msra.mxu1 %v3005_v5  ;;  %v1609_v34 = vand.u32 4294901760, %v3293_v31 }
  0x17   :  { %2659 = vmatpush3.msra.mxu0 %v3024_v10  ;;  %2673 = vmatprep.subr.mxu1 %v2961_v3  ;;  %v1122_v10 = vsub.f32 %v3204_v2, %v1121_v7 }
  0x18   :  { %2660 = vmatprep.subr.mxu0 %v2961_v3  ;;  %2674 = vmatpush3.msra.mxu1 %v3007_v6 }
  0x19   :  { %2661 = vmatpush3.msra.mxu0 %v3027_v11  ;;  %2666 = vmatprep.mubr.msk.f32.mxu0 %vm2962_vm1, %v2961_v3 }
  0x1a   :  { %2662 = vmatprep.subr.mxu0 %v2961_v3  ;;  %2675 = vmatprep.subr.mxu1 %v2961_v3 }
  0x1b   :  { %2663 = vmatpush3.msra.mxu0 %v3030_v12  ;;  %2676 = vmatpush3.msra.mxu1 %v3015_v9  ;;  %v1123_v12 = vand.u32 4294901760, %v1122_v10 }
  0x1c   :  { %2664 = vmatprep.subr.mxu0 %v2961_v3  ;;  %2678 = vmatmul.mubr.f32.vlgmr.msra.gmra.mxu1 %v121_v30 }
  0x1d   :  { %2665 = vmatpush3.msra.mxu0 %v3034_v13  ;;  %2691 = vmatprep.subr.mxu1 %v2961_v3 }
  0x1e   :  { %2667 = vmatmul.mubr.f32.vlgmr.msra.gmra.mxu0 %v120_v29  ;;  %2680 = vmatprep.subr.mxu0 %v2961_v3 }
  0x1f   :  { %2681 = vmatpush3.msra.mxu0 %v156_v14  ;;  %2692 = vmatpush3.msra.mxu1 %v3002_v4  ;;  %v3207_v4 = vand.u32 4294901760, %v992_v62 }
  0x20   :  { %2682 = vmatprep.subr.mxu0 %v2961_v3  ;;  %2693 = vmatprep.subr.mxu1 %v2961_v3 }
  0x21   :  { %2683 = vmatpush3.msra.mxu0 %v163_v15  ;;  %2694 = vmatpush3.msra.mxu1 %v3005_v5  ;;  %v1109_v5 = vand.u32 4294901760, %v1108_v0  ;;  %v1064_v8 = vsub.f32 %v992_v62, %v3207_v4  ;;  %v39_v15 = vld [vmem:[%s3502_s3 + $0x40] sm:$0xff] }
  0x22   :  { %2684 = vmatprep.subr.mxu0 %v2961_v3  ;;  %2695 = vmatprep.subr.mxu1 %v2961_v3 }
  0x23   :  { %2685 = vmatpush3.msra.mxu0 %v170_v16  ;;  %2696 = vmatpush3.msra.mxu1 %v3007_v6  ;;  %v1115_v6 = vsub.f32 %v3192_v60, %v1114_v1  ;;  %v1065_v11 = vand.u32 4294901760, %v1064_v8  ;;  %v3239_v16 = vand.u32 4294901760, %v39_v15 }
  0x24   :  { %2686 = vmatprep.subr.mxu0 %v2961_v3  ;;  %2688 = vmatprep.mubr.msk.f32.mxu0 %vm2962_vm1, %v2961_v3 }
  0x25   :  { %2687 = vmatpush3.msra.mxu0 %v177_v17  ;;  %2697 = vmatprep.subr.mxu1 %v2961_v3  ;;  %v1066_v13 = vsub.f32 %v1064_v8, %v1065_v11  ;;  %v38_v17 = vld [vmem:[%s3502_s3 + $0x38] sm:$0xff]  ;;  %v3250_v18 = vsub.f32 %v39_v15, %v3239_v16 }
  0x26   :  { %2689 = vmatmul.mubr.f32.vlgmr.msra.gmra.mxu0 %v3059_v27  ;;  %2698 = vmatpush3.msra.mxu1 %v3015_v9  ;;  %v1116_v9 = vand.u32 4294901760, %v1115_v6  ;;  %v3252_v19 = vand.u32 4294901760, %v38_v17 }
  0x27   :  { %2699 = vmatprep.mubr.msk.f32.mxu1 %vm2962_vm1, %v2961_v3  ;;  %2702 = vmatprep.subr.mxu0 %v2961_v3  ;;  %v1067_v14 = vand.u32 4294901760, %v1066_v13  ;;  %v1588_v21 = vand.u32 4294901760, %v3250_v18 }
  0x28   :  { %2700 = vmatmul.mubr.f32.vlgmr.msra.gmra.mxu1 %v3059_v27  ;;  %2703 = vmatpush3.msra.mxu0 %v3078_v36  ;;  %v3262_v22 = vsub.f32 %v38_v17, %v3252_v19  ;;  %v3279_v27 = vsub.f32 %v37_v20, %v3264_v23 }
  0x29   :  { %2707 = vmatprep.subr.mxu1 %v2961_v3  ;;  %2704 = vmatprep.mubr.msk.f32.mxu0 %vm2962_vm1, %v2961_v3  ;;  %v1589_v25 = vsub.f32 %v3250_v18, %v1588_v21 }
  0x2a   :  { %2708 = vmatpush3.msra.mxu1 %v650_v44  ;;  %2705 = vmatmul.mubr.f32.vlgmr.msra.gmra.mxu0 %v609_v45  ;;  %v1595_v26 = vand.u32 4294901760, %v3262_v22  ;;  %v1602_v30 = vand.u32 4294901760, %v3279_v27 }
  0x2b   :  { %2709 = vmatprep.mubr.msk.f32.mxu1 %vm2962_vm1, %v2961_v3  ;;  %2712 = vmatprep.subr.mxu0 %v2961_v3  ;;  %v1590_v32 = vand.u32 4294901760, %v1589_v25 }
  0x2c   :  { %2710 = vmatmul.mubr.f32.vlgmr.msra.gmra.mxu1 %v3080_v37  ;;  %2713 = vmatpush3.msra.mxu0 %v647_v38  ;;  %v1596_v29 = vsub.f32 %v3262_v22, %v1595_v26  ;;  %v1603_v33 = vsub.f32 %v3279_v27, %v1602_v30 }
  0x2d   :  { %2717 = vmatprep.subr.mxu1 %v2961_v3  ;;  %2714 = vmatprep.mubr.msk.f32.mxu0 %vm2962_vm1, %v2961_v3 }
  0x2e   :  { %2718 = vmatpush3.msra.mxu1 %v3078_v36  ;;  %2715 = vmatmul.mubr.f32.vlgmr.msra.gmra.mxu0 %v606_v39  ;;  %v1597_v35 = vand.u32 4294901760, %v1596_v29 }
  0x2f   :  { %2719 = vmatprep.mubr.msk.f32.mxu1 %vm2962_vm1, %v2961_v3  ;;  %2722 = vmatprep.subr.mxu0 %v2961_v3 }
  0x30   :  { %2720 = vmatmul.mubr.f32.vlgmr.msra.gmra.mxu1 %v607_v41  ;;  %2723 = vmatpush3.msra.mxu0 %v648_v40 }
  0x31   :  { %2727 = vmatprep.subr.mxu1 %v2961_v3  ;;  %2724 = vmatprep.mubr.msk.f32.mxu0 %vm2962_vm1, %v2961_v3 }
  0x32   :  { %2728 = vmatpush3.msra.mxu1 %v3078_v36  ;;  %2725 = vmatmul.mubr.f32.vlgmr.msra.gmra.mxu0 %v3080_v37  ;;  %v1610_v36 = vsub.f32 %v3293_v31, %v1609_v34 }
  0x33   :  { %2729 = vmatprep.mubr.msk.f32.mxu1 %vm2962_vm1, %v2961_v3  ;;  %2732 = vmatprep.subr.mxu0 %v2961_v3 }
  0x34   :  { %2730 = vmatmul.mubr.f32.vlgmr.msra.gmra.mxu1 %v3080_v37  ;;  %2743 = vmatprep.subr.mxu1 %v2961_v3  ;;  %v1604_v37 = vand.u32 4294901760, %v1603_v33  ;;  %v1611_v38 = vand.u32 4294901760, %v1610_v36 }
  0x35   :  { %2740 = vmatprep.mubr.msk.f32.mxu0 %vm2962_vm1, %v2961_v3  ;;  %2751 = vmatprep.mubr.msk.f32.mxu1 %vm2962_vm1, %v2961_v3 }
  0x36   :  { %2733 = vmatpush3.msra.mxu0 %v3160_v48  ;;  %2744 = vmatpush3.msra.mxu1 %v1102_v63 }
  0x37   :  { %2734 = vmatprep.subr.mxu0 %v2961_v3  ;;  %2745 = vmatprep.subr.mxu1 %v2961_v3 }
  0x38   :  { %2735 = vmatpush3.msra.mxu0 %v3169_v51  ;;  %2746 = vmatpush3.msra.mxu1 %v1109_v5 }
  0x39   :  { %2736 = vmatprep.subr.mxu0 %v2961_v3  ;;  %2747 = vmatprep.subr.mxu1 %v2961_v3 }
  0x3a   :  { %2737 = vmatpush3.msra.mxu0 %v3180_v55  ;;  %2748 = vmatpush3.msra.mxu1 %v1116_v9 }
  0x3b   :  { %2738 = vmatprep.subr.mxu0 %v2961_v3  ;;  %2749 = vmatprep.subr.mxu1 %v2961_v3 }
  0x3c   :  { %2739 = vmatpush3.msra.mxu0 %v3194_v61  ;;  %2750 = vmatpush3.msra.mxu1 %v1123_v12 }
  0x3d   :  { %2754 = vmatprep.subr.mxu0 %v2961_v3  ;;  %2765 = vmatprep.subr.mxu1 %v2961_v3 }
  0x3e   :  { %2752 = vmatmul.mubr.f32.vlgmr.msra.gmra.mxu1 %v3207_v4  ;;  %2741 = vmatmul.mubr.f32.vlgmr.msra.gmra.mxu0 %v1067_v14 }
  0x3f   :  { %2766 = vmatpush3.msra.mxu1 %v3160_v48  ;;  %2773 = vmatprep.mubr.msk.f32.mxu1 %vm2962_vm1, %v2961_v3 }
  0x40   :  { %2767 = vmatprep.subr.mxu1 %v2961_v3  ;;  %2755 = vmatpush3.msra.mxu0 %v3167_v50 }
  0x41   :  { %2768 = vmatpush3.msra.mxu1 %v3169_v51  ;;  %2756 = vmatprep.subr.mxu0 %v2961_v3 }
  0x42   :  { %2769 = vmatprep.subr.mxu1 %v2961_v3  ;;  %2757 = vmatpush3.msra.mxu0 %v3178_v54 }
  0x43   :  { %2770 = vmatpush3.msra.mxu1 %v3180_v55  ;;  %2758 = vmatprep.subr.mxu0 %v2961_v3 }
  0x44   :  { %2771 = vmatprep.subr.mxu1 %v2961_v3  ;;  %2759 = vmatpush3.msra.mxu0 %v3192_v60 }
  0x45   :  { %2772 = vmatpush3.msra.mxu1 %v3194_v61  ;;  %2760 = vmatprep.subr.mxu0 %v2961_v3 }
  0x46   :  { %2762 = vmatprep.mubr.msk.f32.mxu0 %vm2962_vm1, %v2961_v3  ;;  %2761 = vmatpush3.msra.mxu0 %v3204_v2 }
  0x47   :  { %2787 = vmatprep.subr.mxu1 %v2961_v3  ;;  %2776 = vmatprep.subr.mxu0 %v2961_v3 }
  0x48   :  { %2763 = vmatmul.mubr.f32.vlgmr.msra.gmra.mxu0 %v1064_v8  ;;  %2774 = vmatmul.mubr.f32.vlgmr.msra.gmra.mxu1 %v1065_v11 }
  0x49   :  { %2777 = vmatpush3.msra.mxu0 %v1100_v53  ;;  %2788 = vmatpush3.msra.mxu1 %v3160_v48 }
  0x4a   :  { %2778 = vmatprep.subr.mxu0 %v2961_v3  ;;  %2789 = vmatprep.subr.mxu1 %v2961_v3 }
  0x4b   :  { %2779 = vmatpush3.msra.mxu0 %v1107_v59  ;;  %2790 = vmatpush3.msra.mxu1 %v3169_v51 }
  0x4c   :  { %2780 = vmatprep.subr.mxu0 %v2961_v3  ;;  %2791 = vmatprep.subr.mxu1 %v2961_v3 }
  0x4d   :  { %2781 = vmatpush3.msra.mxu0 %v1114_v1  ;;  %2792 = vmatpush3.msra.mxu1 %v3180_v55 }
  0x4e   :  { %2782 = vmatprep.subr.mxu0 %v2961_v3  ;;  %2793 = vmatprep.subr.mxu1 %v2961_v3 }
  0x4f   :  { %2783 = vmatpush3.msra.mxu0 %v1121_v7  ;;  %2784 = vmatprep.mubr.msk.f32.mxu0 %vm2962_vm1, %v2961_v3  ;;  %v2501_v7 = vld [vmem:[%s3502_s3 + $0x88] ss:$0 sm:$0xff] }
  0x50   :  { %2794 = vmatpush3.msra.mxu1 %v3194_v61  ;;  %2785 = vmatmul.mubr.f32.vlgmr.msra.gmra.mxu0 %v3207_v4 }
  0x51   :  { %2795 = vmatprep.mubr.msk.f32.mxu1 %vm2962_vm1, %v2961_v3  ;;  %2809 = vmatprep.subr.mxu1 %v2961_v3 }
  0x52   :  { %2796 = vmatmul.mubr.f32.vlgmr.msra.gmra.mxu1 %v3207_v4  ;;  %2798 = vmatprep.subr.mxu0 %v2961_v3 }
  0x53   :  { %2810 = vmatpush3.msra.mxu1 %v1590_v32  ;;  %2817 = vmatprep.mubr.msk.f32.mxu1 %vm2962_vm1, %v2961_v3 }
  0x54   :  { %2811 = vmatprep.subr.mxu1 %v2961_v3  ;;  %2799 = vmatpush3.msra.mxu0 %v3239_v16 }
  0x55   :  { %2812 = vmatpush3.msra.mxu1 %v1597_v35  ;;  %2800 = vmatprep.subr.mxu0 %v2961_v3 }
  0x56   :  { %2813 = vmatprep.subr.mxu1 %v2961_v3  ;;  %2801 = vmatpush3.msra.mxu0 %v3252_v19 }
  0x57   :  { %2814 = vmatpush3.msra.mxu1 %v1604_v37  ;;  %2802 = vmatprep.subr.mxu0 %v2961_v3  ;;  %v1981_v37 = vld [vmem:[%s3502_s3 + $0x80] sm:$0xff] }
  0x58   :  { %2815 = vmatprep.subr.mxu1 %v2961_v3  ;;  %2803 = vmatpush3.msra.mxu0 %v3264_v23 }
  0x59   :  { %2816 = vmatpush3.msra.mxu1 %v1611_v38  ;;  %2804 = vmatprep.subr.mxu0 %v2961_v3  ;;  %v3389_v38 = vand.u32 4294901760, %v1981_v37 }
  0x5a   :  { %2831 = vmatprep.subr.mxu1 %v2961_v3  ;;  %2805 = vmatpush3.msra.mxu0 %v3281_v28 }
  0x5b   :  { %2806 = vmatprep.mubr.msk.f32.mxu0 %vm2962_vm1, %v2961_v3  ;;  %2820 = vmatprep.subr.mxu0 %v2961_v3 }
  0xd3   :  { %v216_v39 = vpop.f32.mrf.mxu1 }
  0xd5   :  { %v2657_v40 = vpop.f32.mrf.mxu1 }
  0xd6   :  { %v125_v41 = vpop.f32.mrf.mxu0  ;;  %v3395_v40 = vsub.f32 %v1981_v37, %v3389_v38 }
  0xd7   :  { %v217_v46 = vadd.f32 %v216_v39, %v125_v41  ;;  %v1980_v39 = vld [vmem:[%s3502_s3 + $0x78] sm:$0xff] }
  0xd8   :  { %v2646_v42 = vpop.f32.mrf.mxu0  ;;  %v3397_v41 = vand.u32 4294901760, %v1980_v39 }
  0xd9   :  { %v1979_v42 = vld [vmem:[%s3502_s3 + $0x70] sm:$0xff] }
  0xdc   :  { %v373_v43 = vpop.f32.mrf.mxu1 }
  0xde   :  { %v296_v44 = vpop.f32.mrf.mxu0  ;;  %v2679_v45 = vpop.f32.mrf.mxu1 }
  0xdf   :  { %v297_v48 = vadd.f32 %v296_v44, %v217_v46  ;;  %v3406_v44 = vsub.f32 %v1980_v39, %v3397_v41  ;;  %v3408_v45 = vand.u32 4294901760, %v1979_v42  ;;  %v1978_v46 = vld [vmem:[%s3502_s3 + $0x68] sm:$0xff] }
  0xe0   :  { %v2668_v47 = vpop.f32.mrf.mxu0 }
  0xe1   :  { %v374_v49 = vadd.f32 %v373_v43, %v297_v48  ;;  %v2096_v43 = vand.u32 4294901760, %v3395_v40  ;;  %v2103_v48 = vand.u32 4294901760, %v3406_v44 }
  0xe3   :  { %v2097_v47 = vsub.f32 %v3395_v40, %v2096_v43 }
  0xe6   :  { %v456_v50 = vpop.f32.mrf.mxu0 }
  0xe7   :  { %v457_v51 = vadd.f32 %v456_v50, %v374_v49  ;;  %v3420_v49 = vsub.f32 %v1979_v42, %v3408_v45  ;;  %v3422_v50 = vand.u32 4294901760, %v1978_v46 }
  0xe8   :  { %v531_v52 = vpop.f32.mrf.mxu1  ;;  %v2690_v53 = vpop.f32.mrf.mxu0 }
  0xe9   :  { %v532_v54 = vadd.f32 %v531_v52, %v457_v51  ;;  %v2098_v51 = vand.u32 4294901760, %v2097_v47  ;;  %v2104_v52 = vsub.f32 %v3406_v44, %v2103_v48  ;;  %v2110_v53 = vand.u32 4294901760, %v3420_v49 }
  0xea   :  { %v2701_v55 = vpop.f32.mrf.mxu1  ;;  %v611_v56 = vpop.f32.mrf.mxu0 }
  0xeb   :  { %v612_v57 = vadd.f32 %v611_v56, %v532_v54  ;;  %v3431_v54 = vsub.f32 %v1978_v46, %v3422_v50  ;;  %v2105_v55 = vand.u32 4294901760, %v2104_v52  ;;  %v2111_v56 = vsub.f32 %v3420_v49, %v2110_v53 }
  0xec   :  { %v687_v58 = vpop.f32.mrf.mxu1  ;;  %v2706_v59 = vpop.f32.mrf.mxu0 }
  0xed   :  { %v688_v60 = vadd.f32 %v687_v58, %v612_v57  ;;  %v2117_v57 = vand.u32 4294901760, %v3431_v54  ;;  %v2112_v58 = vand.u32 4294901760, %v2111_v56 }
  0xee   :  { %v2711_v61 = vpop.f32.mrf.mxu1  ;;  %v761_v62 = vpop.f32.mrf.mxu0 }
  0xef   :  { %v762_v63 = vadd.f32 %v761_v62, %v688_v60  ;;  %v2118_v59 = vsub.f32 %v3431_v54, %v2117_v57 }
  0xf0   :  { %v835_v0 = vpop.f32.mrf.mxu1  ;;  %v2716_v1 = vpop.f32.mrf.mxu0 }
  0xf1   :  { %v836_v2 = vadd.f32 %v835_v0, %v762_v63  ;;  %v2119_v60 = vand.u32 4294901760, %v2118_v59 }
  0xf2   :  { %v2721_v4 = vpop.f32.mrf.mxu1  ;;  %v909_v5 = vpop.f32.mrf.mxu0 }
  0xf3   :  { %v910_v6 = vadd.f32 %v909_v5, %v836_v2 }
  0xf4   :  { %v981_v8 = vpop.f32.mrf.mxu1  ;;  %v2726_v9 = vpop.f32.mrf.mxu0 }
  0xf5   :  { %v982_v10 = vadd.f32 %v981_v8, %v910_v6 }
  0xf6   :  { %v2731_v11 = vpop.f32.mrf.mxu1 }
  0xf7   :  { %v989_v12 = vadd.f32 %v2501_v7, %v982_v10 }
  0xf9   :  { %2935 = vtanh.f32 %v989_v12 }
 0x106   :  { %v2936_v13 = vpop.eup %2935 }
 0x107   :  { %1973 = vst.msk [vmem:[#allocation2] sm:$0xff] %vm23_vm0, %v2936_v13  ;;  %2475 = vst.msk [vmem:[#allocation4] sm:$0xff] %vm23_vm0, %v2936_v13  ;;  %v1480_v14 = vsel %vm23_vm0, %v2936_v13, 0 }
 0x108   :  { %v1551_v15 = vand.u32 4294901760, %v1480_v14 }
 0x10a   :  { %v1552_v17 = vsub.f32 %v1480_v14, %v1551_v15  ;;  %2818 = vmatmul.mubr.f32.vlgmr.msra.gmra.mxu1 %v1551_v15  ;;  %v2502_v14 = vld [vmem:[%s3502_s3 + $0x90] ss:$0 sm:$0xff] }
 0x10b   :  { %2832 = vmatpush3.msra.mxu1 %v3239_v16  ;;  %2839 = vmatprep.mubr.msk.f32.mxu1 %vm2962_vm1, %v2961_v3 }
 0x10c   :  { %2833 = vmatprep.subr.mxu1 %v2961_v3  ;;  %v1553_v20 = vand.u32 4294901760, %v1552_v17 }
 0x10d   :  { %2834 = vmatpush3.msra.mxu1 %v3252_v19 }
 0x10e   :  { %2835 = vmatprep.subr.mxu1 %v2961_v3  ;;  %v1554_v24 = vsub.f32 %v1552_v17, %v1553_v20 }
 0x10f   :  { %2836 = vmatpush3.msra.mxu1 %v3264_v23 }
 0x110   :  { %2837 = vmatprep.subr.mxu1 %v2961_v3  ;;  %v1555_v25 = vand.u32 4294901760, %v1554_v24 }
 0x111   :  { %2838 = vmatpush3.msra.mxu1 %v3281_v28 }
 0x112   :  { %2840 = vmatmul.mubr.f32.vlgmr.msra.gmra.mxu1 %v1553_v20  ;;  %2853 = vmatprep.subr.mxu1 %v2961_v3 }
 0x113   :  { %2807 = vmatmul.mubr.f32.vlgmr.msra.gmra.mxu0 %v1555_v25  ;;  %2854 = vmatpush3.msra.mxu1 %v3239_v16  ;;  %v1160_v16 = vpop.f32.mrf.mxu1 }
 0x114   :  { %2821 = vmatpush3.msra.mxu0 %v3250_v18  ;;  %2855 = vmatprep.subr.mxu1 %v2961_v3  ;;  %v1069_v18 = vpop.f32.mrf.mxu0 }
 0x115   :  { %2822 = vmatprep.subr.mxu0 %v2961_v3  ;;  %2856 = vmatpush3.msra.mxu1 %v3252_v19  ;;  %v2753_v19 = vpop.f32.mrf.mxu1 }
 0x116   :  { %2823 = vmatpush3.msra.mxu0 %v3262_v22  ;;  %2857 = vmatprep.subr.mxu1 %v2961_v3  ;;  %v2742_v22 = vpop.f32.mrf.mxu0 }
 0x117   :  { %2824 = vmatprep.subr.mxu0 %v2961_v3  ;;  %2858 = vmatpush3.msra.mxu1 %v3264_v23 }
 0x118   :  { %2825 = vmatpush3.msra.mxu0 %v3279_v27  ;;  %2859 = vmatprep.subr.mxu1 %v2961_v3  ;;  %v1240_v23 = vpop.f32.mrf.mxu0  ;;  %v1317_v27 = vpop.f32.mrf.mxu1 }
 0x119   :  { %2826 = vmatprep.subr.mxu0 %v2961_v3  ;;  %2828 = vmatprep.mubr.msk.f32.mxu0 %vm2962_vm1, %v2961_v3 }
 0x11a   :  { %2827 = vmatpush3.msra.mxu0 %v3293_v31  ;;  %2860 = vmatpush3.msra.mxu1 %v3281_v28  ;;  %v2764_v28 = vpop.f32.mrf.mxu0 }
 0x11b   :  { %2861 = vmatprep.mubr.msk.f32.mxu1 %vm2962_vm1, %v2961_v3  ;;  %2829 = vmatmul.mubr.f32.vlgmr.msra.gmra.mxu0 %v1552_v17 }
 0x11c   :  { %2842 = vmatprep.subr.mxu0 %v2961_v3  ;;  %2862 = vmatmul.mubr.f32.vlgmr.msra.gmra.mxu1 %v1551_v15  ;;  %v1400_v32 = vpop.f32.mrf.mxu0 }
 0x11d   :  { %2843 = vmatpush3.msra.mxu0 %v1588_v21  ;;  %2850 = vmatprep.mubr.msk.f32.mxu0 %vm2962_vm1, %v2961_v3  ;;  %v1161_v21 = vadd.f32 %v1160_v16, %v1069_v18 }
 0x11e   :  { %2844 = vmatprep.subr.mxu0 %v2961_v3  ;;  %2875 = vmatprep.subr.mxu1 %v2961_v3 }
 0x11f   :  { %2845 = vmatpush3.msra.mxu0 %v1595_v26  ;;  %2883 = vmatprep.mubr.msk.f32.mxu1 %vm2962_vm1, %v2961_v3  ;;  %v1241_v26 = vadd.f32 %v1240_v23, %v1161_v21 }
 0x120   :  { %2846 = vmatprep.subr.mxu0 %v2961_v3  ;;  %2876 = vmatpush3.msra.mxu1 %v2098_v51 }
 0x121   :  { %2847 = vmatpush3.msra.mxu0 %v1602_v30  ;;  %v1318_v29 = vadd.f32 %v1317_v27, %v1241_v26  ;;  %v2775_v30 = vpop.f32.mrf.mxu1  ;;  %2877 = vmatprep.subr.mxu1 %v2961_v3 }
 0x122   :  { %2848 = vmatprep.subr.mxu0 %v2961_v3  ;;  %2878 = vmatpush3.msra.mxu1 %v2105_v55 }
 0x123   :  { %2849 = vmatpush3.msra.mxu0 %v1609_v34  ;;  %v1401_v31 = vadd.f32 %v1400_v32, %v1318_v29  ;;  %v1475_v33 = vpop.f32.mrf.mxu1  ;;  %v2786_v34 = vpop.f32.mrf.mxu0  ;;  %2879 = vmatprep.subr.mxu1 %v2961_v3 }
 0x124   :  { %2851 = vmatmul.mubr.f32.vlgmr.msra.gmra.mxu0 %v1551_v15  ;;  %2864 = vmatprep.subr.mxu0 %v2961_v3 }
 0x125   :  { %2872 = vmatprep.mubr.msk.f32.mxu0 %vm2962_vm1, %v2961_v3  ;;  %v1476_v35 = vadd.f32 %v1475_v33, %v1401_v31  ;;  %v2797_v36 = vpop.f32.mrf.mxu1  ;;  %2865 = vmatpush3.msra.mxu0 %v3389_v38  ;;  %v2503_v31 = vld [vmem:[%s3502_s3 + $0x98] ss:$0 sm:$0xff]  ;;  %s2939_s3 = scalar_lea.vmem %s2494_s2, 128 }
 0x126   :  { %2866 = vmatprep.subr.mxu0 %v2961_v3  ;;  %2880 = vmatpush3.msra.mxu1 %v2112_v58  ;;  %p2940_p0 = scmp.ne.s32.totalorder %s2494_s2, %s2939_s3  ;;  %p2945_p2 = scmp.lt.s32.totalorder %s2939_s3, %s2939_s3 }
 0x127   :  { %2867 = vmatpush3.msra.mxu0 %v3397_v41  ;;  %2881 = vmatprep.subr.mxu1 %v2961_v3 }
 0x128   :  { %2868 = vmatprep.subr.mxu0 %v2961_v3  ;;  %2882 = vmatpush3.msra.mxu1 %v2119_v60  ;;  %p2946_p3 = por %p2945_p2, %p2944_p1 }
 0x129   :  { %2869 = vmatpush3.msra.mxu0 %v3408_v45  ;;  %2897 = vmatprep.subr.mxu1 %v2961_v3 }
 0x12a   :  { %2870 = vmatprep.subr.mxu0 %v2961_v3  ;;  %p2947_p4 = pnand %p2946_p3, %p2940_p0 }
 0x12b   :  { %2871 = vmatpush3.msra.mxu0 %v3422_v50 }
 0x12c   :  { %2886 = vmatprep.subr.mxu0 %v2961_v3 }
 0x1ca   :  { %v1648_v61 = vpop.f32.mrf.mxu1 }
 0x1cc   :  { %v2819_v62 = vpop.f32.mrf.mxu1 }
 0x1d2   :  { %v1805_v63 = vpop.f32.mrf.mxu1 }
 0x1d3   :  { %v1557_v0 = vpop.f32.mrf.mxu0 }
 0x1d4   :  { %v2841_v1 = vpop.f32.mrf.mxu1  ;;  %v1558_v4 = vadd.f32 %v1557_v0, %v1476_v35 }
 0x1d5   :  { %v2808_v2 = vpop.f32.mrf.mxu0 }
 0x1d6   :  { %v1649_v7 = vadd.f32 %v1648_v61, %v1558_v4 }
 0x1db   :  { %v1728_v5 = vpop.f32.mrf.mxu0 }
 0x1dc   :  { %v1963_v6 = vpop.f32.mrf.mxu1  ;;  %v1729_v10 = vadd.f32 %v1728_v5, %v1649_v7 }
 0x1dd   :  { %v2830_v8 = vpop.f32.mrf.mxu0 }
 0x1de   :  { %v2863_v9 = vpop.f32.mrf.mxu1  ;;  %v1806_v11 = vadd.f32 %v1805_v63, %v1729_v10 }
 0x1e4   :  { %v1888_v12 = vpop.f32.mrf.mxu0 }
 0x1e5   :  { %v1889_v13 = vadd.f32 %v1888_v12, %v1806_v11 }
 0x1e6   :  { %v2852_v15 = vpop.f32.mrf.mxu0 }
 0x1e7   :  { %v1964_v17 = vadd.f32 %v1963_v6, %v1889_v13 }
 0x1e9   :  { %v1971_v20 = vadd.f32 %v2502_v14, %v1964_v17 }
 0x1eb   :  { %2937 = vtanh.f32 %v1971_v20 }
 0x1f8   :  { %v2938_v24 = vpop.eup %2937 }
 0x1f9   :  { %1974 = vst.msk [vmem:[#allocation3] sm:$0xff] %vm23_vm0, %v2938_v24  ;;  %2476 = vrot.lane.b32.xlu0 %v2938_v24, %s2963_s28  ;;  %v1988_v25 = vsel %vm23_vm0, %v2938_v24, 0 }
 0x1fa   :  { %v2059_v16 = vand.u32 4294901760, %v1988_v25 }
 0x1fc   :  { %v2060_v18 = vsub.f32 %v1988_v25, %v2059_v16  ;;  %2884 = vmatmul.mubr.f32.vlgmr.msra.gmra.mxu1 %v2059_v16 }
 0x1fd   :  { %2898 = vmatpush3.msra.mxu1 %v3389_v38  ;;  %2905 = vmatprep.mubr.msk.f32.mxu1 %vm2962_vm1, %v2961_v3 }
 0x1fe   :  { %2899 = vmatprep.subr.mxu1 %v2961_v3  ;;  %v2061_v19 = vand.u32 4294901760, %v2060_v18 }
 0x1ff   :  { %2900 = vmatpush3.msra.mxu1 %v3397_v41 }
 0x200   :  { %2901 = vmatprep.subr.mxu1 %v2961_v3  ;;  %v2062_v21 = vsub.f32 %v2060_v18, %v2061_v19 }
 0x201   :  { %2902 = vmatpush3.msra.mxu1 %v3408_v45 }
 0x202   :  { %2903 = vmatprep.subr.mxu1 %v2961_v3  ;;  %v2063_v22 = vand.u32 4294901760, %v2062_v21 }
 0x203   :  { %2904 = vmatpush3.msra.mxu1 %v3422_v50 }
 0x204   :  { %2906 = vmatmul.mubr.f32.vlgmr.msra.gmra.mxu1 %v2061_v19  ;;  %2919 = vmatprep.subr.mxu1 %v2961_v3 }
 0x205   :  { %2873 = vmatmul.mubr.f32.vlgmr.msra.gmra.mxu0 %v2063_v22  ;;  %2920 = vmatpush3.msra.mxu1 %v3389_v38 }
 0x206   :  { %2887 = vmatpush3.msra.mxu0 %v3395_v40  ;;  %2921 = vmatprep.subr.mxu1 %v2961_v3 }
 0x207   :  { %2888 = vmatprep.subr.mxu0 %v2961_v3  ;;  %2922 = vmatpush3.msra.mxu1 %v3397_v41 }
 0x208   :  { %2889 = vmatpush3.msra.mxu0 %v3406_v44  ;;  %2923 = vmatprep.subr.mxu1 %v2961_v3 }
 0x209   :  { %2890 = vmatprep.subr.mxu0 %v2961_v3  ;;  %2924 = vmatpush3.msra.mxu1 %v3408_v45 }
 0x20a   :  { %2891 = vmatpush3.msra.mxu0 %v3420_v49  ;;  %2925 = vmatprep.subr.mxu1 %v2961_v3 }
 0x20b   :  { %2892 = vmatprep.subr.mxu0 %v2961_v3  ;;  %2894 = vmatprep.mubr.msk.f32.mxu0 %vm2962_vm1, %v2961_v3 }
 0x20c   :  { %2893 = vmatpush3.msra.mxu0 %v3431_v54  ;;  %2926 = vmatpush3.msra.mxu1 %v3422_v50 }
 0x20d   :  { %2927 = vmatprep.mubr.msk.f32.mxu1 %vm2962_vm1, %v2961_v3  ;;  %2895 = vmatmul.mubr.f32.vlgmr.msra.gmra.mxu0 %v2060_v18 }
 0x20e   :  { %2908 = vmatprep.subr.mxu0 %v2961_v3  ;;  %2928 = vmatmul.mubr.f32.vlgmr.msra.gmra.mxu1 %v2059_v16 }
 0x20f   :  { %2909 = vmatpush3.msra.mxu0 %v2096_v43  ;;  %2916 = vmatprep.mubr.msk.f32.mxu0 %vm2962_vm1, %v2961_v3 }
 0x210   :  { %2910 = vmatprep.subr.mxu0 %v2961_v3 }
 0x211   :  { %2911 = vmatpush3.msra.mxu0 %v2103_v48 }
 0x212   :  { %2912 = vmatprep.subr.mxu0 %v2961_v3 }
 0x213   :  { %2913 = vmatpush3.msra.mxu0 %v2110_v53 }
 0x214   :  { %2914 = vmatprep.subr.mxu0 %v2961_v3 }
 0x215   :  { %2915 = vmatpush3.msra.mxu0 %v2117_v57 }
 0x216   :  { %2917 = vmatmul.mubr.f32.vlgmr.msra.gmra.mxu0 %v2059_v16 }
 0x26b   :  { %v2477_v23 = vpop.permute.xlu0 %2476 }
 0x26c   :  { %2480 = vst.msk [vmem:[#allocation4] sm:$0xff] %vm2479_vm3, %v2477_v23 }
 0x2bc   :  { %v2156_v26 = vpop.f32.mrf.mxu1 }
 0x2be   :  { %v2885_v27 = vpop.f32.mrf.mxu1 }
 0x2c4   :  { %v2313_v28 = vpop.f32.mrf.mxu1 }
 0x2c5   :  { %v2065_v29 = vpop.f32.mrf.mxu0 }
 0x2c6   :  { %v2907_v30 = vpop.f32.mrf.mxu1  ;;  %v2066_v33 = vadd.f32 %v2503_v31, %v2065_v29 }
 0x2c7   :  { %v2874_v32 = vpop.f32.mrf.mxu0 }
 0x2c8   :  { %v2157_v35 = vadd.f32 %v2156_v26, %v2066_v33 }
 0x2cd   :  { %v2236_v34 = vpop.f32.mrf.mxu0 }
 0x2ce   :  { %v2471_v3 = vpop.f32.mrf.mxu1  ;;  %v2237_v38 = vadd.f32 %v2236_v34, %v2157_v35 }
 0x2cf   :  { %v2896_v36 = vpop.f32.mrf.mxu0 }
 0x2d0   :  { %v2929_v37 = vpop.f32.mrf.mxu1  ;;  %v2314_v39 = vadd.f32 %v2313_v28, %v2237_v38 }
 0x2d6   :  { %v2396_v40 = vpop.f32.mrf.mxu0 }
 0x2d7   :  { %v2397_v41 = vadd.f32 %v2396_v40, %v2314_v39 }
 0x2d8   :  { %v2918_v42 = vpop.f32.mrf.mxu0 }
 0x2d9   :  { %v2472_v43 = vadd.f32 %v2471_v3, %v2397_v41 }
 0x2db   :  { %2482 = vrot.lane.b32.xlu0 %v2472_v43, %s2964_s5 }
 0x34d   :  { %v2483_v44 = vpop.permute.xlu0 %2482 }
 0x34e   :  { %2486 = vst.msk [vmem:[#allocation4] sm:$0xff] %vm2485_vm4, %v2483_v44 }
 0x34f   :  { %2950 = shalt.err (!%p2947_p4)
}
 0x350   :  { %2496 = dma.vmem_to_hbm [thread:$0]  %s2494_s2, 128, %s3503_s4, [#allocation5]  }
 0x351   :  { %2959 = dma.done.wait [#allocation5], 128  }
 0x352   :  { %2960 = vsyncadd [#allocation5], 4294967168 }
 0x353   :  { %2500 = vsyncpa [#allocation5], 1 }

</bundles_post_ra>
